<compile_context>
chip_gen: v7x
topology: tpu7x:2x2x1
jax: 0.10.0
libtpu: 0.0.40
codegen_flags: <defaults>
</compile_context>

<pallas_src>
import functools

import jax
import jax.numpy as jnp
from jax import lax
from jax.experimental import pallas as pl
from jax.experimental.pallas import tpu as pltpu

LANE = 128
SUB = 8


def _round_up(x, m):
    return ((x + m - 1) // m) * m


def _vmem_budget_bytes():
    """Generation-aware VMEM budget with double-buffering headroom."""
    try:
        cap = int(pltpu.get_tpu_info().vmem_capacity_bytes)
    except Exception:
        cap = 128 << 20
    if cap <= (64 << 20):        # v7x-class: 64 MiB physical per TensorCore
        return 40 << 20
    return 96 << 20              # v5e / v6e: 128 MiB physical


def _select_tiles(B, D, C, budget, itemsize):
    """Pick (TB, TK, n_k, Dp, CP) from static shapes and the VMEM budget."""
    CP = _round_up(C, LANE)

    # ---- K (feature) tiling: prefer a fully VMEM-resident weight -----------
    Dp_full = _round_up(D, LANE)
    if Dp_full * CP * itemsize <= budget // 3:
        n_k, TK = 1, Dp_full
    else:
        # double-buffered weight tiles get ~1/3 of the budget
        tk_cap = max(LANE, ((budget // 3) // (2 * CP * itemsize)) // LANE * LANE)
        n_k = pl.cdiv(D, tk_cap)
        TK = _round_up(pl.cdiv(D, n_k), LANE)
    Dp = n_k * TK

    # ---- batch tiling: use whatever VMEM remains ----------------------------
    w_bytes = (1 if n_k == 1 else 2) * TK * CP * itemsize
    bias_bytes = 2 * CP * 4
    left = max(budget - w_bytes - bias_bytes, 1 << 20)
    # per 8 batch rows: double-buffered x tile + f32 accumulator + double-buffered out
    per8 = 2 * SUB * TK * itemsize + SUB * CP * 4 + 2 * SUB * CP * 4
    TB = max(SUB, min((left // per8) * SUB, 1024))
    TB = min(TB, _round_up(B, SUB))
    # megacore (v7x): keep >= 2 tiles on the parallel batch axis when possible
    if B > SUB and pl.cdiv(B, TB) < 2:
        TB = _round_up(pl.cdiv(B, 2), SUB)
    return TB, TK, n_k, Dp, CP


def _linear_kernel(x_ref, w_ref, b_ref, o_ref, acc_ref, *, n_k, k_rem):
    # x_ref: (TB, TK)   batch-tile x K-tile of the flattened input (unpadded HBM)
    # w_ref: (TK, CP)   pre-transposed, zero-padded weight tile (resident if n_k==1)
    # b_ref: (1, CP)    padded bias row (VMEM resident)
    # o_ref: (TB, CP)   lane-dense padded output tile
    # acc_ref: (TB, CP) f32 accumulator scratch
    k = pl.program_id(1)

    @pl.when(k == 0)
    def _init():
        acc_ref[...] = jnp.zeros_like(acc_ref)

    x = x_ref[...]
    if k_rem:  # static: only traced when the last K tile has out-of-range lanes
        tk = x_ref.shape[1]
        col = lax.broadcasted_iota(jnp.int32, x_ref.shape, 1)
        limit = jnp.where(k == n_k - 1, k_rem, tk)
        x = jnp.where(col < limit, x, jnp.zeros((), dtype=x.dtype))

    # Canonical (M,K)x(K,N) MXU contraction with f32 accumulation.
    acc_ref[...] += jnp.dot(x, w_ref[...], preferred_element_type=jnp.float32)

    @pl.when(k == n_k - 1)
    def _finalize():
        o_ref[...] = (acc_ref[...] + b_ref[...]).astype(o_ref.dtype)


@functools.partial(jax.jit, static_argnames=("compute_dtype",))
def softmax_regression_forward(x_nchw, weight, bias, *, compute_dtype=None):
    """Forward pass equivalent to PyTorch: x.view(B, -1) @ weight.T + bias.

    x_nchw : (B, C, H, W) float32
    weight : (num_classes, D) float32   (PyTorch nn.Linear convention)
    bias   : (num_classes,)   float32
    compute_dtype: optionally jnp.bfloat16 to halve the dominant HBM stream
                   (accumulation stays f32). Default None keeps f32 inputs.
    returns: (B, num_classes) float32
    """
    B = x_nchw.shape[0]
    x_flat = x_nchw.reshape(B, -1)               # glue: flatten, plain JAX
    D = x_flat.shape[1]
    C = weight.shape[0]
    out_dtype = x_flat.dtype

    if compute_dtype is not None:                # opt-in bf16 on x / w
        x_flat = x_flat.astype(compute_dtype)
        weight = weight.astype(compute_dtype)
    itemsize = jnp.dtype(x_flat.dtype).itemsize

    budget = _vmem_budget_bytes()
    TB, TK, n_k, Dp, CP = _select_tiles(B, D, C, budget, itemsize)
    n_b = pl.cdiv(B, TB)
    # valid lanes in the last K tile (0 means "exactly aligned, no masking")
    k_rem = 0 if Dp == D else (D - (n_k - 1) * TK)

    # Weight transposed + zero-padded ONCE (small, one-time XLA op); bias padded.
    w_t = jnp.pad(weight.T, ((0, Dp - D), (0, CP - C)))                # (Dp, CP)
    b_p = jnp.pad(bias.astype(jnp.float32), (0, CP - C)).reshape(1, CP)

    # Honest traffic estimate: x read once, weight re-read per batch tile only
    # when it is not VMEM-resident.
    w_passes = 1 if n_k == 1 else n_b
    cost = pl.CostEstimate(
        flops=2 * B * D * CP,
        transcendentals=0,
        bytes_accessed=(B * D * itemsize
                        + w_passes * Dp * CP * itemsize
                        + CP * 4
                        + B * CP * 4),
    )

    out_p = pl.pallas_call(
        functools.partial(_linear_kernel, n_k=n_k, k_rem=k_rem),
        out_shape=jax.ShapeDtypeStruct((B, CP), out_dtype),
        grid_spec=pltpu.PrefetchScalarGridSpec(
            num_scalar_prefetch=0,
            grid=(n_b, n_k),
            in_specs=[
                pl.BlockSpec((TB, TK), lambda i, k: (i, k)),   # x: streamed, unpadded
                pl.BlockSpec((TK, CP), lambda i, k: (k, 0)),   # w: resident when n_k==1
                pl.BlockSpec((1, CP), lambda i, k: (0, 0)),    # bias: VMEM-resident
            ],
            out_specs=pl.BlockSpec((TB, CP), lambda i, k: (i, 0)),
            scratch_shapes=[pltpu.VMEM((TB, CP), jnp.float32)],
        ),
        compiler_params=pltpu.CompilerParams(
            dimension_semantics=("parallel", "arbitrary"),
            vmem_limit_bytes=budget,
        ),
        cost_estimate=cost,
    )(x_flat, w_t, b_p)

    return out_p[:, :C]


if __name__ == "__main__":
    key = jax.random.PRNGKey(0)
    kx, kw, kb = jax.random.split(key, 3)

    # Small shapes consistent with the module's forward (flatten -> linear).
    B, Cin, H, W = 2, 4, 16, 16
    input_size = Cin * H * W          # 1024
    num_classes = 10

    x = jax.random.normal(kx, (B, Cin, H, W), dtype=jnp.float32)
    bound = 1.0 / (input_size ** 0.5)
    weight = jax.random.uniform(kw, (num_classes, input_size),
                                minval=-bound, maxval=bound, dtype=jnp.float32)
    bias = jax.random.uniform(kb, (num_classes,),
                              minval=-bound, maxval=bound, dtype=jnp.float32)

    out = softmax_regression_forward(x, weight, bias)
    out = jax.block_until_ready(out)

    # sanity check against plain-JAX reference
    ref = x.reshape(B, -1) @ weight.T + bias
    assert out.shape == (B, num_classes)
    assert jnp.allclose(out, ref, atol=1e-5, rtol=1e-5)

    print("KERNEL_OK")
</pallas_src>

<mosaic_0001>
module attributes {stable_mosaic.version = 11 : i64} {
  func.func @_linear_kernel(%arg0: i32, %arg1: i32, %arg2: memref<8x1024xf32, #tpu.memory_space<vmem>>, %arg3: memref<1024x128xf32, #tpu.memory_space<vmem>>, %arg4: memref<1x128xf32, #tpu.memory_space<vmem>>, %arg5: memref<8x128xf32, #tpu.memory_space<vmem>>, %arg6: memref<8x128xf32, #tpu.memory_space<vmem>>) attributes {dimension_semantics = [#tpu.dimension_semantics<parallel>, #tpu.dimension_semantics<arbitrary>], iteration_bounds = array<i64: 1, 1>, scalar_prefetch = 0 : i64, scratch_operands = 1 : i64, tpu.core_type = #tpu.core_type<tc>, window_params = [{transform_indices = @transform_0, window_bounds = array<i64: 8, 1024>}, {transform_indices = @transform_1, window_bounds = array<i64: 1024, 128>}, {pipeline_mode = #tpu.pipeline_mode<synchronous>, transform_indices = @transform_2, window_bounds = array<i64: 1, 128>}, {transform_indices = @transform_3, window_bounds = array<i64: 8, 128>}]} {
    %c0_i32 = arith.constant 0 : i32
    %0 = arith.cmpi eq, %arg1, %c0_i32 : i32
    %1 = arith.extui %0 : i1 to i32
    %c0_i32_0 = arith.constant 0 : i32
    %2 = arith.cmpi ne, %1, %c0_i32_0 : i32
    scf.if %2 {
      %cst_10 = arith.constant 0.000000e+00 : f32
      %12 = vector.broadcast %cst_10 : f32 to vector<8x128xf32>
      %c0_11 = arith.constant 0 : index
      %c0_12 = arith.constant 0 : index
      %13 = vector.load %arg6[%c0_11, %c0_12] : memref<8x128xf32, #tpu.memory_space<vmem>>, vector<8x128xf32>
      tpu.vector_store %arg6[%c0_11, %c0_12], %12 {strides = array<i32>} : memref<8x128xf32, #tpu.memory_space<vmem>>, vector<8x128xf32>,
    } else {
    }
    %c0 = arith.constant 0 : index
    %c0_1 = arith.constant 0 : index
    %3 = vector.load %arg2[%c0, %c0_1] : memref<8x1024xf32, #tpu.memory_space<vmem>>, vector<8x1024xf32>
    %c0_2 = arith.constant 0 : index
    %c0_3 = arith.constant 0 : index
    %4 = vector.load %arg6[%c0_2, %c0_3] : memref<8x128xf32, #tpu.memory_space<vmem>>, vector<8x128xf32>
    %c0_4 = arith.constant 0 : index
    %c0_5 = arith.constant 0 : index
    %5 = vector.load %arg3[%c0_4, %c0_5] : memref<1024x128xf32, #tpu.memory_space<vmem>>, vector<1024x128xf32>
    %cst = arith.constant dense<0.000000e+00> : vector<8x128xf32>
    %6 = tpu.matmul %3, %5, %cst {dimension_numbers = #tpu.dot_dimension_numbers<[1], [0], [0], [1], [0, 0, 1, 1], [], []>} : vector<8x1024xf32>, vector<1024x128xf32>, vector<8x128xf32> -> vector<8x128xf32>
    %7 = arith.addf %4, %6 : vector<8x128xf32>
    %c0_6 = arith.constant 0 : index
    %c0_7 = arith.constant 0 : index
    %8 = vector.load %arg6[%c0_6, %c0_7] : memref<8x128xf32, #tpu.memory_space<vmem>>, vector<8x128xf32>
    tpu.vector_store %arg6[%c0_6, %c0_7], %7 {strides = array<i32>} : memref<8x128xf32, #tpu.memory_space<vmem>>, vector<8x128xf32>,
    %c0_i32_8 = arith.constant 0 : i32
    %9 = arith.cmpi eq, %arg1, %c0_i32_8 : i32
    %10 = arith.extui %9 : i1 to i32
    %c0_i32_9 = arith.constant 0 : i32
    %11 = arith.cmpi ne, %10, %c0_i32_9 : i32
    scf.if %11 {
      %c0_10 = arith.constant 0 : index
      %c0_11 = arith.constant 0 : index
      %12 = vector.load %arg6[%c0_10, %c0_11] : memref<8x128xf32, #tpu.memory_space<vmem>>, vector<8x128xf32>
      %c0_12 = arith.constant 0 : index
      %c0_13 = arith.constant 0 : index
      %13 = vector.load %arg4[%c0_12, %c0_13] : memref<1x128xf32, #tpu.memory_space<vmem>>, vector<1x128xf32>
      %14 = vector.broadcast %13 : vector<1x128xf32> to vector<8x128xf32>
      %15 = arith.addf %12, %14 : vector<8x128xf32>
      %c0_14 = arith.constant 0 : index
      %c0_15 = arith.constant 0 : index
      %16 = vector.load %arg5[%c0_14, %c0_15] : memref<8x128xf32, #tpu.memory_space<vmem>>, vector<8x128xf32>
      tpu.vector_store %arg5[%c0_14, %c0_15], %15 {strides = array<i32>} : memref<8x128xf32, #tpu.memory_space<vmem>>, vector<8x128xf32>,
    } else {
    }
    return
  }
  func.func @transform_0(%arg0: i32, %arg1: i32) -> (i32, i32) {
    %c0_i32 = arith.constant 0 : i32
    return %arg0, %arg1 : i32, i32
  }
  func.func @transform_1(%arg0: i32, %arg1: i32) -> (i32, i32) {
    %c0_i32 = arith.constant 0 : i32
    %c0_i32_0 = arith.constant 0 : i32
    return %arg1, %c0_i32 : i32, i32
  }
  func.func @transform_2(%arg0: i32, %arg1: i32) -> (i32, i32) {
    %c0_i32 = arith.constant 0 : i32
    %c0_i32_0 = arith.constant 0 : i32
    %c0_i32_1 = arith.constant 0 : i32
    return %c0_i32, %c0_i32_0 : i32, i32
  }
  func.func @transform_3(%arg0: i32, %arg1: i32) -> (i32, i32) {
    %c0_i32 = arith.constant 0 : i32
    %c0_i32_0 = arith.constant 0 : i32
    return %arg0, %c0_i32 : i32, i32
  }
}

</mosaic_0001>

<bundles_post_ra>
// kernel: softmax_regression_forward.1
= control target key start
LH: loop header
LB: loop body
LE: loop exit
PB: predicated region body
PF: predicated region fallthrough
CT: control target
= control target key end

     0   :  { %8 = vsyncpa [#allocation4], 0  ;;  %s1072_s0 = inlined_call_operand.hbm [shape: f32[2,1024], index: 0, kind: input, shape index: {}]   ;;  %s1073_s1 = inlined_call_operand.hbm [shape: f32[1024,128], index: 1, kind: input, shape index: {}]   ;;  %s1074_s2 = inlined_call_operand.hbm [shape: f32[1,128], index: 2, kind: input, shape index: {}]   ;;  %s1075_s3 = inlined_call_operand.hbm [shape: f32[2,128], index: 3, kind: output, shape index: {}]  }
   0x1   :  { %9 = vsyncpa [#allocation7], 0 }
   0x2   :  { %10 = vsyncpa [#allocation5], 0 }
   0x3   :  { %15 = vsyncadd [#allocation4], 768  ;;  %s983_s12 = smov [#allocation6]   ;;  %s889_s16 = scalar_lea.hbm %s1073_s1, 16384 }
   0x4   :  { %s28_s13 = sshll.u32 %s983_s12, 4  ;;  %p890_p0 = scmp.ne.s32.totalorder %s1073_s1, %s889_s16  ;;  %s29_s13 = int_to_ptr.vmem [resolvable:$true] %s28_s13 }
   0x5   :  { %p893_p1 = scmp.lt.u32.totalorder %s889_s16, %s1073_s1 }
   0x7   :  { %p895_p2 = pnand %p893_p1, %p890_p0 }
   0x9   :  { %898 = shalt.err (!%p895_p2)
}
   0xa   :  { %s899_s21 = scalar_lea.vmem %s29_s13, 16384  ;;  %p904_p4 = scmp.lt.s32.totalorder %s29_s13, %s29_s13 }
   0xb   :  { %p900_p3 = scmp.ne.s32.totalorder %s29_s13, %s899_s21  ;;  %p905_p5 = scmp.lt.s32.totalorder %s899_s21, %s899_s21 }
   0xd   :  { %p906_p6 = por %p905_p5, %p904_p4 }
   0xf   :  { %p907_p7 = pnand %p906_p6, %p900_p3 }
  0x11   :  { %910 = shalt.err (!%p907_p7)
}
  0x12   :  { %s984_s22 = smov 128   ;;  %s985_s23 = smov 8  }
  0x13   :  { %34 = dma.hbm_to_vmem [thread:$0]  %s1073_s1, 16384, %s29_s13, [#allocation7], %s984_s22, %s984_s22, %s985_s23  }
  0x14   :  { %s986_s26 = smov [#allocation3]   ;;  %s911_s30 = scalar_lea.hbm %s1072_s0, 256 }
  0x15   :  { %s16_s27 = sshll.u32 %s986_s26, 4  ;;  %p912_p8 = scmp.ne.s32.totalorder %s1072_s0, %s911_s30  ;;  %s17_s27 = int_to_ptr.vmem [resolvable:$true] %s16_s27 }
  0x16   :  { %p915_p9 = scmp.lt.u32.totalorder %s911_s30, %s1072_s0 }
  0x18   :  { %p917_p10 = pnand %p915_p9, %p912_p8 }
  0x1a   :  { %920 = shalt.err (!%p917_p10)
}
  0x1b   :  { %s921_s8 = scalar_lea.vmem %s17_s27, 256  ;;  %s925_s1 = scalar_lea.vmem %s17_s27, 1024 }
  0x1c   :  { %p922_p11 = scmp.ne.s32.totalorder %s17_s27, %s921_s8  ;;  %p926_p12 = scmp.lt.s32.totalorder %s17_s27, %s17_s27 }
  0x1d   :  { %p927_p13 = scmp.lt.s32.totalorder %s925_s1, %s921_s8 }
  0x1f   :  { %p928_p0 = por %p927_p13, %p926_p12 }
  0x21   :  { %p929_p1 = pnand %p928_p0, %p922_p11 }
  0x23   :  { %932 = shalt.err (!%p929_p1)
}
  0x24   :  { %s987_s9 = smov 256   ;;  %s988_s10 = smov 16  }
  0x25   :  { %22 = dma.hbm_to_vmem [thread:$0]  %s1072_s0, 256, %s17_s27, [#allocation4], %s987_s9, %s987_s9, %s988_s10  }
  0x26   :  { %s989_s13 = smov [#allocation8]   ;;  %s933_s17 = scalar_lea.hbm %s1074_s2, 16 }
  0x27   :  { %s41_s14 = sshll.u32 %s989_s13, 4  ;;  %p934_p2 = scmp.ne.s32.totalorder %s1074_s2, %s933_s17  ;;  %s42_s14 = int_to_ptr.vmem [resolvable:$true] %s41_s14 }
  0x28   :  { %p937_p3 = scmp.lt.u32.totalorder %s933_s17, %s1074_s2 }
  0x2a   :  { %p939_p4 = pnand %p937_p3, %p934_p2 }
  0x2c   :  { %942 = shalt.err (!%p939_p4)
}
  0x2d   :  { %s943_s22 = scalar_lea.vmem %s42_s14, 16  ;;  %s947_s0 = scalar_lea.vmem %s42_s14, 32 }
  0x2e   :  { %p944_p5 = scmp.ne.s32.totalorder %s42_s14, %s943_s22  ;;  %p948_p6 = scmp.lt.s32.totalorder %s42_s14, %s42_s14 }
  0x2f   :  { %p949_p7 = scmp.lt.s32.totalorder %s947_s0, %s943_s22 }
  0x31   :  { %p950_p8 = por %p949_p7, %p948_p6 }
  0x33   :  { %p951_p9 = pnand %p950_p8, %p944_p5 }
  0x35   :  { %954 = shalt.err (!%p951_p9)
}
  0x36   :  { %44 = dma.hbm_to_vmem [thread:$0]  %s1074_s2, 16, %s42_s14, [#allocation7]  }
  0x37   :  { %977 = dma.done.wait [#allocation4], 1024  }
  0x38   :  { %978 = vsyncadd [#allocation4], 4294966272 }
  0x39   :  { %979 = dma.done.wait [#allocation7], 16400  }
  0x3a   :  { %980 = vsyncadd [#allocation7], 4294950896  ;;  %v84_v0 = vld [vmem:[#allocation6 + $0x80] sm:$0xff]  ;;  %v85_v1 = vld [vmem:[#allocation6 + $0x88] sm:$0xff]  ;;  %v990_v51 = vmov 1983009808   ;;  %v211_v53 = vlaneseq }
  0x3b   :  { %v116_v2 = vld [vmem:[#allocation6 + $0x180] sm:$0xff]  ;;  %v738_v3 = vpack.c.bf16 %v85_v1, %v84_v0  ;;  %v117_v4 = vld [vmem:[#allocation6 + $0x188] sm:$0xff]  ;;  %v86_v11 = vld [vmem:[#allocation6 + $0x90] sm:$0xff]  ;;  %v209_v52 = vunpack.c.l.s4 %v990_v51 }
  0x3c   :  { %v68_v5 = vld [vmem:[#allocation6] sm:$0xff]  ;;  %v69_v6 = vld [vmem:[#allocation6 + $0x8] sm:$0xff]  ;;  %v770_v7 = vpack.c.bf16 %v117_v4, %v116_v2  ;;  %v87_v13 = vld [vmem:[#allocation6 + $0x98] sm:$0xff] }
  0x3d   :  { %v740_v8 = vpack.c.bf16 %v69_v6, %v68_v5  ;;  %v100_v9 = vld [vmem:[#allocation6 + $0x100] sm:$0xff]  ;;  %v101_v10 = vld [vmem:[#allocation6 + $0x108] sm:$0xff]  ;;  %739 = vmatprep.subr.bf16.mxu0 %v738_v3  ;;  %v118_v14 = vld [vmem:[#allocation6 + $0x190] sm:$0xff]  ;;  %v742_v16 = vpack.c.bf16 %v87_v13, %v86_v11  ;;  %v210_v4 = vunpack.c.0.s8 %v209_v52  ;;  %v212_v5 = vshrl.u32 %v211_v53, 7 }
  0x3e   :  { %v772_v12 = vpack.c.bf16 %v101_v10, %v100_v9  ;;  %v119_v15 = vld [vmem:[#allocation6 + $0x198] sm:$0xff]  ;;  %771 = vmatprep.subr.bf16.mxu1 %v770_v7  ;;  %v70_v18 = vld [vmem:[#allocation6 + $0x10] sm:$0xff]  ;;  %v88_v23 = vld [vmem:[#allocation6 + $0xa0] sm:$0xff] }
  0x3f   :  { %741 = vmatpush3.bf16.msra.mxu0 %v740_v8  ;;  %v774_v17 = vpack.c.bf16 %v119_v15, %v118_v14  ;;  %v71_v19 = vld [vmem:[#allocation6 + $0x18] sm:$0xff]  ;;  %v102_v20 = vld [vmem:[#allocation6 + $0x110] sm:$0xff]  ;;  %v89_v24 = vld [vmem:[#allocation6 + $0xa8] sm:$0xff] }
  0x40   :  { %773 = vmatpush3.bf16.msra.mxu1 %v772_v12  ;;  %v744_v21 = vpack.c.bf16 %v71_v19, %v70_v18  ;;  %v103_v22 = vld [vmem:[#allocation6 + $0x118] sm:$0xff]  ;;  %743 = vmatprep.subr.bf16.mxu0 %v742_v16  ;;  %v746_v26 = vpack.c.bf16 %v89_v24, %v88_v23  ;;  %v120_v27 = vld [vmem:[#allocation6 + $0x1a0] sm:$0xff]  ;;  %v121_v28 = vld [vmem:[#allocation6 + $0x1a8] sm:$0xff] }
  0x41   :  { %775 = vmatprep.subr.bf16.mxu1 %v774_v17  ;;  %v776_v25 = vpack.c.bf16 %v103_v22, %v102_v20  ;;  %v72_v29 = vld [vmem:[#allocation6 + $0x20] sm:$0xff]  ;;  %v778_v30 = vpack.c.bf16 %v121_v28, %v120_v27  ;;  %v73_v31 = vld [vmem:[#allocation6 + $0x28] sm:$0xff]  ;;  %v90_v35 = vld [vmem:[#allocation6 + $0xb0] sm:$0xff]  ;;  %v1050_v22 = vsub.s32 %v210_v4, %v212_v5 }
  0x42   :  { %v104_v32 = vld [vmem:[#allocation6 + $0x120] sm:$0xff]  ;;  %v105_v33 = vld [vmem:[#allocation6 + $0x128] sm:$0xff]  ;;  %v748_v34 = vpack.c.bf16 %v73_v31, %v72_v29  ;;  %v91_v36 = vld [vmem:[#allocation6 + $0xb8] sm:$0xff] }
  0x43   :  { %745 = vmatpush3.bf16.msra.mxu0 %v744_v21  ;;  %v122_v37 = vld [vmem:[#allocation6 + $0x1b0] sm:$0xff]  ;;  %v780_v38 = vpack.c.bf16 %v105_v33, %v104_v32  ;;  %v750_v39 = vpack.c.bf16 %v91_v36, %v90_v35  ;;  %v123_v40 = vld [vmem:[#allocation6 + $0x1b8] sm:$0xff]  ;;  %v92_v46 = vld [vmem:[#allocation6 + $0xc0] sm:$0xff] }
  0x44   :  { %777 = vmatpush3.bf16.msra.mxu1 %v776_v25  ;;  %747 = vmatprep.subr.bf16.mxu0 %v746_v26  ;;  %v74_v41 = vld [vmem:[#allocation6 + $0x30] sm:$0xff]  ;;  %v75_v42 = vld [vmem:[#allocation6 + $0x38] sm:$0xff]  ;;  %v782_v43 = vpack.c.bf16 %v123_v40, %v122_v37  ;;  %v93_v47 = vld [vmem:[#allocation6 + $0xc8] sm:$0xff] }
  0x45   :  { %779 = vmatprep.subr.bf16.mxu1 %v778_v30  ;;  %v106_v44 = vld [vmem:[#allocation6 + $0x130] sm:$0xff]  ;;  %v107_v45 = vld [vmem:[#allocation6 + $0x138] sm:$0xff]  ;;  %v124_v48 = vld [vmem:[#allocation6 + $0x1c0] sm:$0xff]  ;;  %v752_v50 = vpack.c.bf16 %v75_v42, %v74_v41  ;;  %v754_v55 = vpack.c.bf16 %v93_v47, %v92_v46 }
  0x46   :  { %v125_v49 = vld [vmem:[#allocation6 + $0x1c8] sm:$0xff]  ;;  %v784_v54 = vpack.c.bf16 %v107_v45, %v106_v44  ;;  %v76_v56 = vld [vmem:[#allocation6 + $0x40] sm:$0xff]  ;;  %v94_v61 = vld [vmem:[#allocation6 + $0xd0] sm:$0xff] }
  0x47   :  { %749 = vmatpush3.bf16.msra.mxu0 %v748_v34  ;;  %v77_v57 = vld [vmem:[#allocation6 + $0x48] sm:$0xff]  ;;  %v108_v58 = vld [vmem:[#allocation6 + $0x140] sm:$0xff]  ;;  %v786_v59 = vpack.c.bf16 %v125_v49, %v124_v48  ;;  %v95_v62 = vld [vmem:[#allocation6 + $0xd8] sm:$0xff] }
  0x48   :  { %781 = vmatpush3.bf16.msra.mxu1 %v780_v38  ;;  %751 = vmatprep.subr.bf16.mxu0 %v750_v39  ;;  %v109_v60 = vld [vmem:[#allocation6 + $0x148] sm:$0xff]  ;;  %v126_v63 = vld [vmem:[#allocation6 + $0x1d0] sm:$0xff]  ;;  %v127_v0 = vld [vmem:[#allocation6 + $0x1d8] sm:$0xff]  ;;  %v756_v1 = vpack.c.bf16 %v77_v57, %v76_v56  ;;  %v758_v7 = vpack.c.bf16 %v95_v62, %v94_v61 }
  0x49   :  { %783 = vmatprep.subr.bf16.mxu1 %v782_v43  ;;  %v78_v2 = vld [vmem:[#allocation6 + $0x50] sm:$0xff]  ;;  %v79_v3 = vld [vmem:[#allocation6 + $0x58] sm:$0xff]  ;;  %v788_v6 = vpack.c.bf16 %v109_v60, %v108_v58  ;;  %v96_v10 = vld [vmem:[#allocation6 + $0xe0] sm:$0xff]  ;;  %v790_v11 = vpack.c.bf16 %v127_v0, %v126_v63 }
  0x4a   :  { %v110_v8 = vld [vmem:[#allocation6 + $0x150] sm:$0xff]  ;;  %v111_v9 = vld [vmem:[#allocation6 + $0x158] sm:$0xff]  ;;  %v97_v12 = vld [vmem:[#allocation6 + $0xe8] sm:$0xff]  ;;  %v760_v18 = vpack.c.bf16 %v79_v3, %v78_v2 }
  0x4b   :  { %753 = vmatpush3.bf16.msra.mxu0 %v752_v50  ;;  %v128_v13 = vld [vmem:[#allocation6 + $0x1e0] sm:$0xff]  ;;  %v129_v14 = vld [vmem:[#allocation6 + $0x1e8] sm:$0xff]  ;;  %v98_v20 = vld [vmem:[#allocation6 + $0xf0] sm:$0xff]  ;;  %v792_v23 = vpack.c.bf16 %v111_v9, %v110_v8  ;;  %v762_v24 = vpack.c.bf16 %v97_v12, %v96_v10 }
  0x4c   :  { %785 = vmatpush3.bf16.msra.mxu1 %v784_v54  ;;  %755 = vmatprep.subr.bf16.mxu0 %v754_v55  ;;  %v80_v15 = vld [vmem:[#allocation6 + $0x60] sm:$0xff]  ;;  %v81_v16 = vld [vmem:[#allocation6 + $0x68] sm:$0xff]  ;;  %v99_v21 = vld [vmem:[#allocation6 + $0xf8] sm:$0xff]  ;;  %v794_v27 = vpack.c.bf16 %v129_v14, %v128_v13 }
  0x4d   :  { %787 = vmatprep.subr.bf16.mxu1 %v786_v59  ;;  %v112_v17 = vld [vmem:[#allocation6 + $0x160] sm:$0xff]  ;;  %v113_v19 = vld [vmem:[#allocation6 + $0x168] sm:$0xff]  ;;  %v130_v25 = vld [vmem:[#allocation6 + $0x1f0] sm:$0xff]  ;;  %v764_v32 = vpack.c.bf16 %v81_v16, %v80_v15  ;;  %v766_v34 = vpack.c.bf16 %v99_v21, %v98_v20 }
  0x4e   :  { %v131_v26 = vld [vmem:[#allocation6 + $0x1f8] sm:$0xff]  ;;  %v877_v28 = vld [vmem:[#allocation3] ss:$16 sps:$4 sm:$0xff]   ;;  %v881_v30 = vld [vmem:[#allocation3 + $0x4] ss:$16 sps:$4 sm:$0xff]   ;;  %v796_v33 = vpack.c.bf16 %v113_v19, %v112_v17 }
  0x4f   :  { %757 = vmatpush3.bf16.msra.mxu0 %v756_v1  ;;  %v879_v29 = vld [vmem:[#allocation3 + $0x20] ss:$16 sps:$4 sm:$0xff]   ;;  %v882_v31 = vld [vmem:[#allocation3 + $0x24] ss:$16 sps:$4 sm:$0xff]   ;;  %v214_v35 = vrot.slane %v877_v28, %v1050_v22  ;;  %v83_v37 = vld [vmem:[#allocation6 + $0x78] sm:$0xff]  ;;  %v221_v40 = vrot.slane %v881_v30, %v1050_v22  ;;  %v798_v42 = vpack.c.bf16 %v131_v26, %v130_v25 }
  0x50   :  { %789 = vmatpush3.bf16.msra.mxu1 %v788_v6  ;;  %759 = vmatprep.subr.bf16.mxu0 %v758_v7  ;;  %v82_v36 = vld [vmem:[#allocation6 + $0x70] sm:$0xff]  ;;  %v228_v39 = vrot.slane %v879_v29, %v1050_v22  ;;  %v235_v41 = vrot.slane %v882_v31, %v1050_v22  ;;  %v115_v43 = vld [vmem:[#allocation6 + $0x178] sm:$0xff]  ;;  %v148_v44 = vld [vmem:[#allocation6 + $0x280] sm:$0xff] }
  0x51   :  { %791 = vmatprep.subr.bf16.mxu1 %v790_v11  ;;  %v114_v38 = vld [vmem:[#allocation6 + $0x170] sm:$0xff]  ;;  %v149_v45 = vld [vmem:[#allocation6 + $0x288] sm:$0xff]  ;;  %v180_v48 = vld [vmem:[#allocation6 + $0x380] sm:$0xff]  ;;  %v768_v50 = vpack.c.bf16 %v83_v37, %v82_v36 }
  0x52   :  { %v237_v46 = vcombine.high %v214_v35, %v228_v39  ;;  %v239_v47 = vcombine.high %v221_v40, %v235_v41  ;;  %v181_v49 = vld [vmem:[#allocation6 + $0x388] sm:$0xff]  ;;  %v800_v51 = vpack.c.bf16 %v115_v43, %v114_v38  ;;  %v802_v52 = vpack.c.bf16 %v149_v45, %v148_v44  ;;  %v132_v53 = vld [vmem:[#allocation6 + $0x200] sm:$0xff]  ;;  %v150_v58 = vld [vmem:[#allocation6 + $0x290] sm:$0xff] }
  0x53   :  { %761 = vmatpush3.bf16.msra.mxu0 %v760_v18  ;;  %v133_v54 = vld [vmem:[#allocation6 + $0x208] sm:$0xff]  ;;  %v164_v55 = vld [vmem:[#allocation6 + $0x300] sm:$0xff]  ;;  %v834_v56 = vpack.c.bf16 %v181_v49, %v180_v48  ;;  %v151_v59 = vld [vmem:[#allocation6 + $0x298] sm:$0xff]  ;;  %v236_v60 = vcombine.low %v214_v35, %v228_v39  ;;  %v238_v63 = vcombine.low %v221_v40, %v235_v41 }
  0x54   :  { %793 = vmatpush3.bf16.msra.mxu1 %v792_v23  ;;  %763 = vmatprep.subr.bf16.mxu0 %v762_v24  ;;  %v165_v57 = vld [vmem:[#allocation6 + $0x308] sm:$0xff]  ;;  %v182_v61 = vld [vmem:[#allocation6 + $0x390] sm:$0xff]  ;;  %v183_v62 = vld [vmem:[#allocation6 + $0x398] sm:$0xff]  ;;  %v804_v0 = vpack.c.bf16 %v133_v54, %v132_v53  ;;  %v806_v2 = vpack.c.bf16 %v151_v59, %v150_v58 }
  0x55   :  { %795 = vmatprep.subr.bf16.mxu1 %v794_v27  ;;  %348 = vmatprep.mubr.f32.mxu0 %v237_v46  ;;  %v836_v1 = vpack.c.bf16 %v165_v57, %v164_v55  ;;  %v134_v3 = vld [vmem:[#allocation6 + $0x210] sm:$0xff]  ;;  %v135_v4 = vld [vmem:[#allocation6 + $0x218] sm:$0xff]  ;;  %v838_v6 = vpack.c.bf16 %v183_v62, %v182_v61  ;;  %v152_v8 = vld [vmem:[#allocation6 + $0x2a0] sm:$0xff] }
  0x56   :  { %418 = vmatprep.mubr.f32.mxu1 %v239_v47  ;;  %v166_v5 = vld [vmem:[#allocation6 + $0x310] sm:$0xff]  ;;  %v167_v7 = vld [vmem:[#allocation6 + $0x318] sm:$0xff]  ;;  %v153_v9 = vld [vmem:[#allocation6 + $0x2a8] sm:$0xff]  ;;  %v808_v12 = vpack.c.bf16 %v135_v4, %v134_v3 }
  0x57   :  { %765 = vmatpush3.bf16.msra.mxu0 %v764_v32  ;;  %v184_v10 = vld [vmem:[#allocation6 + $0x3a0] sm:$0xff]  ;;  %v185_v11 = vld [vmem:[#allocation6 + $0x3a8] sm:$0xff]  ;;  %v840_v13 = vpack.c.bf16 %v167_v7, %v166_v5  ;;  %v810_v14 = vpack.c.bf16 %v153_v9, %v152_v8  ;;  %v154_v20 = vld [vmem:[#allocation6 + $0x2b0] sm:$0xff] }
  0x58   :  { %797 = vmatpush3.bf16.msra.mxu1 %v796_v33  ;;  %767 = vmatprep.subr.bf16.mxu0 %v766_v34  ;;  %v136_v15 = vld [vmem:[#allocation6 + $0x220] sm:$0xff]  ;;  %v137_v16 = vld [vmem:[#allocation6 + $0x228] sm:$0xff]  ;;  %v842_v18 = vpack.c.bf16 %v185_v11, %v184_v10  ;;  %v155_v21 = vld [vmem:[#allocation6 + $0x2b8] sm:$0xff] }
  0x59   :  { %799 = vmatprep.subr.bf16.mxu1 %v798_v42  ;;  %v168_v17 = vld [vmem:[#allocation6 + $0x320] sm:$0xff]  ;;  %v169_v19 = vld [vmem:[#allocation6 + $0x328] sm:$0xff]  ;;  %v186_v23 = vld [vmem:[#allocation6 + $0x3b0] sm:$0xff]  ;;  %v812_v25 = vpack.c.bf16 %v137_v16, %v136_v15  ;;  %v814_v27 = vpack.c.bf16 %v155_v21, %v154_v20 }
  0x5a   :  { %v187_v24 = vld [vmem:[#allocation6 + $0x3b8] sm:$0xff]  ;;  %v844_v26 = vpack.c.bf16 %v169_v19, %v168_v17  ;;  %v138_v28 = vld [vmem:[#allocation6 + $0x230] sm:$0xff]  ;;  %v156_v33 = vld [vmem:[#allocation6 + $0x2c0] sm:$0xff] }
  0x5b   :  { %769 = vmatpush3.bf16.msra.mxu0 %v768_v50  ;;  %v139_v29 = vld [vmem:[#allocation6 + $0x238] sm:$0xff]  ;;  %v170_v30 = vld [vmem:[#allocation6 + $0x330] sm:$0xff]  ;;  %v846_v31 = vpack.c.bf16 %v187_v24, %v186_v23  ;;  %v157_v34 = vld [vmem:[#allocation6 + $0x2c8] sm:$0xff] }
  0x5c   :  { %801 = vmatpush3.bf16.msra.mxu1 %v800_v51  ;;  %803 = vmatprep.subr.bf16.mxu0 %v802_v52  ;;  %v171_v32 = vld [vmem:[#allocation6 + $0x338] sm:$0xff]  ;;  %v140_v35 = vld [vmem:[#allocation6 + $0x240] sm:$0xff]  ;;  %v141_v36 = vld [vmem:[#allocation6 + $0x248] sm:$0xff]  ;;  %v816_v40 = vpack.c.bf16 %v139_v29, %v138_v28  ;;  %v818_v45 = vpack.c.bf16 %v157_v34, %v156_v33 }
  0x5d   :  { %835 = vmatprep.subr.bf16.mxu1 %v834_v56  ;;  %v188_v37 = vld [vmem:[#allocation6 + $0x3c0] sm:$0xff]  ;;  %v189_v38 = vld [vmem:[#allocation6 + $0x3c8] sm:$0xff]  ;;  %v158_v42 = vld [vmem:[#allocation6 + $0x2d0] sm:$0xff]  ;;  %v848_v44 = vpack.c.bf16 %v171_v32, %v170_v30  ;;  %v820_v53 = vpack.c.bf16 %v141_v36, %v140_v35 }
  0x5e   :  { %349 = vmatmul.mubr.f32.vlgmr.msra.gmra.mrb[0].mxu0 %v236_v60  ;;  %v172_v39 = vld [vmem:[#allocation6 + $0x340] sm:$0xff]  ;;  %v173_v41 = vld [vmem:[#allocation6 + $0x348] sm:$0xff]  ;;  %v159_v43 = vld [vmem:[#allocation6 + $0x2d8] sm:$0xff]  ;;  %v850_v48 = vpack.c.bf16 %v189_v38, %v188_v37 }
  0x5f   :  { %419 = vmatmul.mubr.f32.vlgmr.msra.gmra.mrb[0].mxu1 %v238_v63  ;;  %805 = vmatpush3.bf16.msra.mxu0 %v804_v0  ;;  %v190_v46 = vld [vmem:[#allocation6 + $0x3d0] sm:$0xff]  ;;  %v191_v47 = vld [vmem:[#allocation6 + $0x3d8] sm:$0xff]  ;;  %v852_v54 = vpack.c.bf16 %v173_v41, %v172_v39  ;;  %v822_v55 = vpack.c.bf16 %v159_v43, %v158_v42  ;;  %v192_v3 = vld [vmem:[#allocation6 + $0x3e0] sm:$0xff] }
  0x60   :  { %837 = vmatpush3.bf16.msra.mxu1 %v836_v1  ;;  %807 = vmatprep.subr.bf16.mxu0 %v806_v2  ;;  %v883_v49 = vld [vmem:[#allocation3 + $0x8] ss:$16 sps:$4 sm:$0xff]   ;;  %v887_v51 = vld [vmem:[#allocation3 + $0xc] ss:$16 sps:$4 sm:$0xff]   ;;  %v142_v57 = vld [vmem:[#allocation6 + $0x250] sm:$0xff]  ;;  %v854_v63 = vpack.c.bf16 %v191_v47, %v190_v46 }
  0x61   :  { %839 = vmatprep.subr.bf16.mxu1 %v838_v6  ;;  %v885_v50 = vld [vmem:[#allocation3 + $0x28] ss:$16 sps:$4 sm:$0xff]   ;;  %v888_v52 = vld [vmem:[#allocation3 + $0x2c] ss:$16 sps:$4 sm:$0xff]   ;;  %v250_v56 = vrot.slane %v883_v49, %v1050_v22  ;;  %v174_v59 = vld [vmem:[#allocation6 + $0x350] sm:$0xff]  ;;  %v257_v61 = vrot.slane %v887_v51, %v1050_v22 }
  0x62   :  { %v143_v58 = vld [vmem:[#allocation6 + $0x258] sm:$0xff]  ;;  %v264_v60 = vrot.slane %v885_v50, %v1050_v22  ;;  %v271_v62 = vrot.slane %v888_v52, %v1050_v22  ;;  %v160_v1 = vld [vmem:[#allocation6 + $0x2e0] sm:$0xff]  ;;  %v161_v2 = vld [vmem:[#allocation6 + $0x2e8] sm:$0xff] }
  0x63   :  { %809 = vmatpush3.bf16.msra.mxu0 %v808_v12  ;;  %v175_v0 = vld [vmem:[#allocation6 + $0x358] sm:$0xff]  ;;  %v193_v4 = vld [vmem:[#allocation6 + $0x3e8] sm:$0xff]  ;;  %v824_v7 = vpack.c.bf16 %v143_v58, %v142_v57  ;;  %v826_v9 = vpack.c.bf16 %v161_v2, %v160_v1  ;;  %v144_v10 = vld [vmem:[#allocation6 + $0x260] sm:$0xff] }
  0x64   :  { %841 = vmatpush3.bf16.msra.mxu1 %v840_v13  ;;  %811 = vmatprep.subr.bf16.mxu0 %v810_v14  ;;  %v273_v5 = vcombine.high %v250_v56, %v264_v60  ;;  %v275_v6 = vcombine.high %v257_v61, %v271_v62  ;;  %v856_v8 = vpack.c.bf16 %v175_v0, %v174_v59  ;;  %v145_v11 = vld [vmem:[#allocation6 + $0x268] sm:$0xff]  ;;  %v176_v12 = vld [vmem:[#allocation6 + $0x360] sm:$0xff]  ;;  %v162_v14 = vld [vmem:[#allocation6 + $0x2f0] sm:$0xff] }
  0x65   :  { %843 = vmatprep.subr.bf16.mxu1 %v842_v18  ;;  %v858_v22 = vpack.c.bf16 %v193_v4, %v192_v3  ;;  %v177_v13 = vld [vmem:[#allocation6 + $0x368] sm:$0xff]  ;;  %v163_v15 = vld [vmem:[#allocation6 + $0x2f8] sm:$0xff]  ;;  %v194_v16 = vld [vmem:[#allocation6 + $0x3f0] sm:$0xff]  ;;  %v828_v18 = vpack.c.bf16 %v145_v11, %v144_v10  ;;  %v272_v29 = vcombine.low %v250_v56, %v264_v60  ;;  %v274_v30 = vcombine.low %v257_v61, %v271_v62 }
  0x66   :  { %488 = vmatprep.mubr.f32.mxu0 %v273_v5  ;;  %v195_v17 = vld [vmem:[#allocation6 + $0x3f8] sm:$0xff]  ;;  %558 = vmatprep.mubr.f32.mxu1 %v275_v6  ;;  %v860_v19 = vpack.c.bf16 %v177_v13, %v176_v12  ;;  %v830_v20 = vpack.c.bf16 %v163_v15, %v162_v14  ;;  %v146_v21 = vld [vmem:[#allocation6 + $0x270] sm:$0xff] }
  0x67   :  { %813 = vmatpush3.bf16.msra.mxu0 %v812_v25  ;;  %v147_v23 = vld [vmem:[#allocation6 + $0x278] sm:$0xff]  ;;  %v862_v24 = vpack.c.bf16 %v195_v17, %v194_v16  ;;  %v178_v25 = vld [vmem:[#allocation6 + $0x370] sm:$0xff] }
  0x68   :  { %845 = vmatpush3.bf16.msra.mxu1 %v844_v26  ;;  %815 = vmatprep.subr.bf16.mxu0 %v814_v27  ;;  %v179_v26 = vld [vmem:[#allocation6 + $0x378] sm:$0xff]  ;;  %v832_v27 = vpack.c.bf16 %v147_v23, %v146_v21 }
  0x69   :  { %847 = vmatprep.subr.bf16.mxu1 %v846_v31  ;;  %v864_v28 = vpack.c.bf16 %v179_v26, %v178_v25 }
  0x6b   :  { %817 = vmatpush3.bf16.msra.mxu0 %v816_v40 }
  0x6c   :  { %849 = vmatpush3.bf16.msra.mxu1 %v848_v44  ;;  %819 = vmatprep.subr.bf16.mxu0 %v818_v45  ;;  %v597_v45 = vld [vmem:[#allocation8] ss:$0 sm:$0xff] }
  0x6d   :  { %851 = vmatprep.subr.bf16.mxu1 %v850_v48 }
  0x6f   :  { %821 = vmatpush3.bf16.msra.mxu0 %v820_v53 }
  0x70   :  { %853 = vmatpush3.bf16.msra.mxu1 %v852_v54  ;;  %823 = vmatprep.subr.bf16.mxu0 %v822_v55 }
  0x71   :  { %855 = vmatprep.subr.bf16.mxu1 %v854_v63 }
  0x73   :  { %825 = vmatpush3.bf16.msra.mxu0 %v824_v7 }
  0x74   :  { %857 = vmatpush3.bf16.msra.mxu1 %v856_v8  ;;  %827 = vmatprep.subr.bf16.mxu0 %v826_v9 }
  0x75   :  { %859 = vmatprep.subr.bf16.mxu1 %v858_v22 }
  0x77   :  { %829 = vmatpush3.bf16.msra.mxu0 %v828_v18 }
  0x78   :  { %861 = vmatpush3.bf16.msra.mxu1 %v860_v19  ;;  %831 = vmatprep.subr.bf16.mxu0 %v830_v20 }
  0x79   :  { %863 = vmatprep.subr.bf16.mxu1 %v862_v24 }
  0x7b   :  { %833 = vmatpush3.bf16.msra.mxu0 %v832_v27 }
  0x7c   :  { %865 = vmatpush3.bf16.msra.mxu1 %v864_v28 }
  0x7e   :  { %489 = vmatmul.mubr.f32.vlgmr.msra.gmra.mrb[2].mxu0 %v272_v29 }
  0x7f   :  { %559 = vmatmul.mubr.f32.vlgmr.msra.gmra.mrb[2].mxu1 %v274_v30 }
 0x131   :  { %v630_v31 = vpop.f32.mrb[0].mxu0 }
 0x132   :  { %v665_v32 = vpop.f32.mrb[0].mxu1  ;;  %v631_v33 = vpop.f32.mrb[1].mxu0 }
 0x133   :  { %v632_v34 = vadd.f32 %v631_v33, %v630_v31  ;;  %v666_v35 = vpop.f32.mrb[1].mxu1 }
 0x134   :  { %v667_v36 = vadd.f32 %v666_v35, %v665_v32 }
 0x136   :  { %v421_v37 = vadd.f32 %v667_v36, %v632_v34 }
 0x151   :  { %v700_v38 = vpop.f32.mrb[2].mxu0 }
 0x152   :  { %v701_v39 = vpop.f32.mrb[3].mxu0  ;;  %v735_v40 = vpop.f32.mrb[2].mxu1 }
 0x153   :  { %v702_v41 = vadd.f32 %v701_v39, %v700_v38  ;;  %v736_v42 = vpop.f32.mrb[3].mxu1 }
 0x154   :  { %v737_v43 = vadd.f32 %v736_v42, %v735_v40 }
 0x155   :  { %v491_v44 = vadd.f32 %v702_v41, %v421_v37 }
 0x157   :  { %v561_v46 = vadd.f32 %v737_v43, %v491_v44 }
 0x159   :  { %v577_v47 = vadd.f32 %v597_v45, %v561_v46 }
 0x15b   :  { %578 = vst [vmem:[#allocation9] sm:$0xff] %v577_v47 }
 0x15c   :  { %583 = vsyncadd [#allocation5], 96  ;;  %s991_s2 = smov [#allocation9]  }
 0x15d   :  { %s584_s25 = sshll.u32 %s991_s2, 4  ;;  %s585_s25 = int_to_ptr.vmem [resolvable:$true] %s584_s25 }
 0x15e   :  { %s955_s26 = scalar_lea.vmem %s585_s25, 32  ;;  %s959_s27 = scalar_lea.vmem %s585_s25, 128 }
 0x15f   :  { %p956_p10 = scmp.ne.s32.totalorder %s585_s25, %s955_s26  ;;  %p960_p11 = scmp.lt.s32.totalorder %s585_s25, %s585_s25 }
 0x160   :  { %p961_p12 = scmp.lt.s32.totalorder %s959_s27, %s955_s26 }
 0x162   :  { %p962_p13 = por %p961_p12, %p960_p11 }
 0x164   :  { %p963_p0 = pnand %p962_p13, %p956_p10 }
 0x166   :  { %966 = shalt.err (!%p963_p0)
}
 0x167   :  { %s967_s30 = scalar_lea.hbm %s1075_s3, 32 }
 0x168   :  { %p968_p1 = scmp.ne.s32.totalorder %s1075_s3, %s967_s30  ;;  %p971_p2 = scmp.lt.u32.totalorder %s967_s30, %s1075_s3 }
 0x16a   :  { %p973_p3 = pnand %p971_p2, %p968_p1 }
 0x16c   :  { %976 = shalt.err (!%p973_p3)
}
 0x16d   :  { %s992_s8 = smov 32   ;;  %s993_s1 = smov 2  }
 0x16e   :  { %590 = dma.vmem_to_hbm [thread:$0]  %s585_s25, 32, %s1075_s3, [#allocation5], %s992_s8, %s992_s8, %s993_s1  }
 0x16f   :  { %981 = dma.done.wait [#allocation5], 128  }
 0x170   :  { %982 = vsyncadd [#allocation5], 4294967168 }
 0x171   :  { %594 = vsyncpa [#allocation4], 1 }
 0x172   :  { %595 = vsyncpa [#allocation7], 1 }
 0x173   :  { %596 = vsyncpa [#allocation5], 1 }

</bundles_post_ra>
